<compile_context>
chip_gen: v7x
topology: tpu7x:2x2x1
jax: 0.10.0
libtpu: 0.0.40
codegen_flags: <defaults>
</compile_context>

<pallas_src>
import jax
import jax.numpy as jnp
from jax.experimental import pallas as pl
from jax.experimental.pallas import tpu as pltpu

NEG_SLOPE = 0.01   # nn.LeakyReLU() default negative_slope
LANE = 128


# --------------------------------------------------------------------------- kernel
def _make_head_kernel(HW, TS, mask_spatial_tail):
    """Build the kernel with the (static) spatial extent closed over for tail masking."""

    def head_kernel(f_ref, w_ref, b_ref, o_ref, mx_ref):
        # f_ref : (TB, TS, C)   feature tile (input dtype, e.g. f32 or bf16)
        # w_ref : (C, NPAD)     Linear weight, zero-padded to a multiple of 128 lanes
        # b_ref : (1, NPAD)     Linear bias, zero-padded, f32
        # o_ref : (TB, NPAD)    lane-dense output block (revisited across spatial axis)
        # mx_ref: (TB, C)       running spatial max, kept in the input dtype
        s = pl.program_id(1)

        @pl.when(s == 0)
        def _init():
            mx_ref[...] = jnp.full(mx_ref.shape, -jnp.inf, dtype=mx_ref.dtype)

        f = f_ref[...]
        if mask_spatial_tail:
            # The last spatial tile reads past H*W; force those rows to -inf so garbage
            # never wins the max.  (row_ids < HW) is all-true for non-tail tiles.
            row_ids = jax.lax.broadcasted_iota(jnp.int32, (TS, f.shape[-1]), 0) + s * TS
            f = jnp.where((row_ids < HW)[None], f, jnp.asarray(-jnp.inf, dtype=f.dtype))

        # Global max pool over this spatial tile, in the input dtype (exact for bf16).
        tile_max = jnp.max(f, axis=1)                        # (TB, C)
        mx_ref[...] = jnp.maximum(mx_ref[...], tile_max)

        @pl.when(s == pl.num_programs(1) - 1)
        def _finalize():
            x = mx_ref[...].astype(jnp.float32)              # (TB, C), f32
            x = jnp.where(x >= 0, x, NEG_SLOPE * x)          # LeakyReLU(0.01)
            # Dropout(0.5): identity in eval mode.
            out = jnp.dot(x, w_ref[...].astype(jnp.float32),
                          preferred_element_type=jnp.float32)    # (TB, NPAD), f32 matmul
            o_ref[...] = (out + b_ref[...].astype(jnp.float32)).astype(o_ref.dtype)

    return head_kernel


# ------------------------------------------------------------------- tiling helpers
def _vmem_budget_bytes():
    """Usable VMEM budget for this kernel's live blocks, derived per generation."""
    try:
        cap = int(pltpu.get_tpu_info().vmem_capacity_bytes)
    except Exception:
        cap = 64 << 20                     # conservative default (v7x per-TC VMEM)
    # ~40 MiB on v7x (64 MiB physical), ~80 MiB on v5e/v6e (128 MiB physical).
    return max(16 << 20, (cap * 5) // 8)


def _pick_batch_tile(B):
    """Batch tile: capped for vreg pressure and (on v7x) so both TensorCores get work."""
    if B <= 8:
        return B                                        # single full-extent tile
    cap = 32                                            # vreg cap: TB=32 x C=512 f32 is safe
    if B >= 16:
        cap = min(cap, max(8, ((B // 2) // 8) * 8))     # keep n_b >= 2 for megacore
    cap = min(cap, (B // 8) * 8)
    for t in range(cap, 7, -8):                         # prefer an exact divisor of B
        if B % t == 0:
            return t
    return cap                                          # ragged tail handled via cdiv grid


def _pick_spatial_tile(HW, TB, C, NPAD, f_item, w_item, budget):
    """Largest multiple-of-8 spatial tile whose double-buffered feature block fits."""
    fixed = (2 * C * NPAD * w_item                 # weight block (pipeline-buffered)
             + 2 * NPAD * 4                        # bias block
             + 2 * TB * NPAD * 4                   # output block
             + TB * C * 4)                         # running-max scratch (f32 upper bound)
    per_buffer = max(0, budget - fixed) // 2       # feature tile is double-buffered
    ts = per_buffer // max(1, TB * C * f_item)
    if ts >= HW:
        return HW                                  # whole spatial extent in one block
    ts = (ts // 8) * 8
    if ts < 8:
        ts = min(8, HW)
    return ts


# ------------------------------------------------------------------------- wrapper
def pad_head_params(w, b):
    """Zero-pad Linear(nc, num_classes) params to a lane-dense 128-wide projection.

    Done once at model init (hoisted out of the per-call wrapper).
    """
    C, num_classes = w.shape
    npad = ((num_classes + LANE - 1) // LANE) * LANE
    w_p = jnp.zeros((C, npad), dtype=w.dtype).at[:, :num_classes].set(w)
    b_p = jnp.zeros((1, npad), dtype=jnp.float32).at[0, :num_classes].set(
        b.astype(jnp.float32))
    return w_p, b_p, num_classes


def classification_single_head_max(feat_nhwc, w_p, b_p, num_classes, spatial_tile=None):
    """feat_nhwc: (B, H, W, C) encoder output (f32 or bf16); w_p/b_p from pad_head_params.

    Returns (B, num_classes) float32 logits (eval-mode head semantics).
    """
    B, H, W, C = feat_nhwc.shape
    HW = H * W
    NPAD = w_p.shape[1]
    f = feat_nhwc.reshape(B, HW, C)

    f_item = jnp.dtype(f.dtype).itemsize
    w_item = jnp.dtype(w_p.dtype).itemsize
    budget = _vmem_budget_bytes()

    # ---- VMEM-budget-aware tiling ---------------------------------------------
    TB = _pick_batch_tile(B)
    if spatial_tile is not None:                    # test hook / manual override
        TS = min(spatial_tile, HW)
    else:
        TS = _pick_spatial_tile(HW, TB, C, NPAD, f_item, w_item, budget)
    n_b = pl.cdiv(B, TB)
    n_s = pl.cdiv(HW, TS)
    mask_spatial_tail = (HW % TS) != 0

    # ---- VMEM limit: actual live bytes + headroom (no double counting) ---------
    live_bytes = (2 * TB * TS * C * f_item          # double-buffered feature tile
                  + 2 * C * NPAD * w_item           # weight block
                  + 2 * NPAD * 4                    # bias block
                  + 2 * TB * NPAD * 4               # output block
                  + TB * C * f_item)                # running-max scratch
    vmem_limit = int(min(max(live_bytes + (4 << 20), 8 << 20), budget + (8 << 20)))

    cost = pl.CostEstimate(
        flops=2 * B * C * NPAD + B * HW * C,        # matmul + max-pool comparisons
        transcendentals=0,
        bytes_accessed=B * HW * C * f_item + C * NPAD * w_item + B * NPAD * 4,
    )

    kernel = _make_head_kernel(HW, TS, mask_spatial_tail)

    out_padded = pl.pallas_call(
        kernel,
        out_shape=jax.ShapeDtypeStruct((B, NPAD), jnp.float32),
        grid_spec=pltpu.PrefetchScalarGridSpec(
            num_scalar_prefetch=0,
            grid=(n_b, n_s),
            in_specs=[
                pl.BlockSpec((TB, TS, C), lambda i, s: (i, s, 0)),
                pl.BlockSpec((C, NPAD), lambda i, s: (0, 0)),
                pl.BlockSpec((1, NPAD), lambda i, s: (0, 0)),
            ],
            out_specs=pl.BlockSpec((TB, NPAD), lambda i, s: (i, 0)),
            scratch_shapes=[pltpu.VMEM((TB, C), f.dtype)],
        ),
        compiler_params=pltpu.CompilerParams(
            dimension_semantics=("parallel", "arbitrary"),
            vmem_limit_bytes=vmem_limit,
        ),
        cost_estimate=cost,
    )(f, w_p, b_p)

    return out_padded[:, :num_classes]


# ----------------------------------------------------------------------- reference
def _reference(feat_nhwc, w, b):
    B, H, W, C = feat_nhwc.shape
    f = feat_nhwc.reshape(B, H * W, C).astype(jnp.float32)
    x = jnp.max(f, axis=1)                          # AdaptiveMaxPool2d((1,1)) + Flatten
    x = jnp.where(x >= 0, x, NEG_SLOPE * x)         # LeakyReLU(0.01)
    return x @ w.astype(jnp.float32) + b.astype(jnp.float32)   # Dropout=identity, Linear


if __name__ == "__main__":
    # Shapes consistent with the module: resnet34 encoder gives nc = 512 channels;
    # head is Linear(nc, num_classes=1). Small spatial/batch for the demo.
    B, H, W, C = 2, 4, 4, 512
    NUM_CLASSES = 1

    key = jax.random.PRNGKey(0)
    k_feat, k_w, k_b = jax.random.split(key, 3)

    feat = jax.random.normal(k_feat, (B, H, W, C), dtype=jnp.float32)
    w = jax.random.normal(k_w, (C, NUM_CLASSES), dtype=jnp.float32) * (1.0 / jnp.sqrt(C))
    b = jax.random.normal(k_b, (NUM_CLASSES,), dtype=jnp.float32) * 0.01

    w_p, b_p, nc_out = pad_head_params(w, b)        # hoisted once at "model init"

    # f32 features.
    out = jax.block_until_ready(classification_single_head_max(feat, w_p, b_p, nc_out))
    ref = _reference(feat, w, b)
    assert out.shape == (B, NUM_CLASSES), out.shape
    assert jnp.allclose(out, ref, atol=1e-4, rtol=1e-4), (out, ref)

    # bf16 features (the main perf lever: halves HBM bytes; max is exact in bf16,
    # LeakyReLU/matmul stay f32 inside the kernel).
    feat_bf16 = feat.astype(jnp.bfloat16)
    out_bf16 = jax.block_until_ready(
        classification_single_head_max(feat_bf16, w_p, b_p, nc_out))
    ref_bf16 = _reference(feat_bf16.astype(jnp.float32), w, b)
    assert jnp.allclose(out_bf16, ref_bf16, atol=5e-2, rtol=5e-2), (out_bf16, ref_bf16)

    # Ragged spatial extent exercising the cdiv grid + tail -inf masking (H*W=15, TS=8).
    H2, W2 = 3, 5
    feat2 = jax.random.normal(jax.random.PRNGKey(1), (B, H2, W2, C), dtype=jnp.float32)
    out2 = jax.block_until_ready(
        classification_single_head_max(feat2, w_p, b_p, nc_out, spatial_tile=8))
    ref2 = _reference(feat2, w, b)
    assert jnp.allclose(out2, ref2, atol=1e-4, rtol=1e-4), (out2, ref2)

    print("KERNEL_OK")
</pallas_src>

<mosaic_0001>
module attributes {stable_mosaic.version = 11 : i64} {
  func.func @head_kernel(%arg0: i32, %arg1: i32, %arg2: memref<2x16x512xf32, #tpu.memory_space<vmem>>, %arg3: memref<512x128xf32, #tpu.memory_space<vmem>>, %arg4: memref<1x128xf32, #tpu.memory_space<vmem>>, %arg5: memref<2x128xf32, #tpu.memory_space<vmem>>, %arg6: memref<2x512xf32, #tpu.memory_space<vmem>>) attributes {dimension_semantics = [#tpu.dimension_semantics<parallel>, #tpu.dimension_semantics<arbitrary>], iteration_bounds = array<i64: 1, 1>, scalar_prefetch = 0 : i64, scratch_operands = 1 : i64, tpu.core_type = #tpu.core_type<tc>, window_params = [{transform_indices = @transform_0, window_bounds = array<i64: 2, 16, 512>}, {pipeline_mode = #tpu.pipeline_mode<synchronous>, transform_indices = @transform_1, window_bounds = array<i64: 512, 128>}, {pipeline_mode = #tpu.pipeline_mode<synchronous>, transform_indices = @transform_2, window_bounds = array<i64: 1, 128>}, {transform_indices = @transform_3, window_bounds = array<i64: 2, 128>}]} {
    %c0_i32 = arith.constant 0 : i32
    %0 = arith.cmpi eq, %arg1, %c0_i32 : i32
    %1 = arith.extui %0 : i1 to i32
    %c0_i32_0 = arith.constant 0 : i32
    %2 = arith.cmpi ne, %1, %c0_i32_0 : i32
    scf.if %2 {
      %cst_9 = arith.constant 0xFF800000 : f32
      %11 = vector.broadcast %cst_9 : f32 to vector<2x512xf32>
      %c0_10 = arith.constant 0 : index
      %c0_11 = arith.constant 0 : index
      %12 = vector.load %arg6[%c0_10, %c0_11] : memref<2x512xf32, #tpu.memory_space<vmem>>, vector<2x512xf32>
      tpu.vector_store %arg6[%c0_10, %c0_11], %11 {strides = array<i32>} : memref<2x512xf32, #tpu.memory_space<vmem>>, vector<2x512xf32>,
    } else {
    }
    %c0 = arith.constant 0 : index
    %c0_1 = arith.constant 0 : index
    %c0_2 = arith.constant 0 : index
    %3 = vector.load %arg2[%c0, %c0_1, %c0_2] : memref<2x16x512xf32, #tpu.memory_space<vmem>>, vector<2x16x512xf32>
    %cst = arith.constant dense<0xFF800000> : vector<2x512xf32>
    %4 = vector.multi_reduction <maximumf>, %3, %cst [1] : vector<2x16x512xf32> to vector<2x512xf32>
    %c0_3 = arith.constant 0 : index
    %c0_4 = arith.constant 0 : index
    %5 = vector.load %arg6[%c0_3, %c0_4] : memref<2x512xf32, #tpu.memory_space<vmem>>, vector<2x512xf32>
    %6 = arith.maximumf %5, %4 : vector<2x512xf32>
    %c0_5 = arith.constant 0 : index
    %c0_6 = arith.constant 0 : index
    %7 = vector.load %arg6[%c0_5, %c0_6] : memref<2x512xf32, #tpu.memory_space<vmem>>, vector<2x512xf32>
    tpu.vector_store %arg6[%c0_5, %c0_6], %6 {strides = array<i32>} : memref<2x512xf32, #tpu.memory_space<vmem>>, vector<2x512xf32>,
    %c0_i32_7 = arith.constant 0 : i32
    %8 = arith.cmpi eq, %arg1, %c0_i32_7 : i32
    %9 = arith.extui %8 : i1 to i32
    %c0_i32_8 = arith.constant 0 : i32
    %10 = arith.cmpi ne, %9, %c0_i32_8 : i32
    scf.if %10 {
      %c0_9 = arith.constant 0 : index
      %c0_10 = arith.constant 0 : index
      %11 = vector.load %arg6[%c0_9, %c0_10] : memref<2x512xf32, #tpu.memory_space<vmem>>, vector<2x512xf32>
      %cst_11 = arith.constant 0.000000e+00 : f32
      %12 = vector.broadcast %cst_11 : f32 to vector<2x512xf32>
      %13 = arith.cmpf oge, %11, %12 : vector<2x512xf32>
      %cst_12 = arith.constant 0.00999999977 : f32
      %14 = vector.broadcast %cst_12 : f32 to vector<2x512xf32>
      %15 = arith.mulf %14, %11 : vector<2x512xf32>
      %16 = arith.select %13, %11, %15 : vector<2x512xi1>, vector<2x512xf32>
      %c0_13 = arith.constant 0 : index
      %c0_14 = arith.constant 0 : index
      %17 = vector.load %arg3[%c0_13, %c0_14] : memref<512x128xf32, #tpu.memory_space<vmem>>, vector<512x128xf32>
      %cst_15 = arith.constant dense<0.000000e+00> : vector<2x128xf32>
      %18 = tpu.matmul %16, %17, %cst_15 {dimension_numbers = #tpu.dot_dimension_numbers<[1], [0], [0], [1], [0, 0, 1, 1], [], []>} : vector<2x512xf32>, vector<512x128xf32>, vector<2x128xf32> -> vector<2x128xf32>
      %c0_16 = arith.constant 0 : index
      %c0_17 = arith.constant 0 : index
      %19 = vector.load %arg4[%c0_16, %c0_17] : memref<1x128xf32, #tpu.memory_space<vmem>>, vector<1x128xf32>
      %20 = vector.broadcast %19 : vector<1x128xf32> to vector<2x128xf32>
      %21 = arith.addf %18, %20 : vector<2x128xf32>
      %c0_18 = arith.constant 0 : index
      %c0_19 = arith.constant 0 : index
      %22 = vector.load %arg5[%c0_18, %c0_19] : memref<2x128xf32, #tpu.memory_space<vmem>>, vector<2x128xf32>
      tpu.vector_store %arg5[%c0_18, %c0_19], %21 {strides = array<i32>} : memref<2x128xf32, #tpu.memory_space<vmem>>, vector<2x128xf32>,
    } else {
    }
    return
  }
  func.func @transform_0(%arg0: i32, %arg1: i32) -> (i32, i32, i32) {
    %c0_i32 = arith.constant 0 : i32
    %c0_i32_0 = arith.constant 0 : i32
    return %arg0, %arg1, %c0_i32 : i32, i32, i32
  }
  func.func @transform_1(%arg0: i32, %arg1: i32) -> (i32, i32) {
    %c0_i32 = arith.constant 0 : i32
    %c0_i32_0 = arith.constant 0 : i32
    %c0_i32_1 = arith.constant 0 : i32
    return %c0_i32, %c0_i32_0 : i32, i32
  }
  func.func @transform_2(%arg0: i32, %arg1: i32) -> (i32, i32) {
    %c0_i32 = arith.constant 0 : i32
    %c0_i32_0 = arith.constant 0 : i32
    %c0_i32_1 = arith.constant 0 : i32
    return %c0_i32, %c0_i32_0 : i32, i32
  }
  func.func @transform_3(%arg0: i32, %arg1: i32) -> (i32, i32) {
    %c0_i32 = arith.constant 0 : i32
    %c0_i32_0 = arith.constant 0 : i32
    return %arg0, %c0_i32 : i32, i32
  }
}

</mosaic_0001>

<bundles_post_ra>
// kernel: tpu_custom_call.1
= control target key start
LH: loop header
LB: loop body
LE: loop exit
PB: predicated region body
PF: predicated region fallthrough
CT: control target
= control target key end

     0   :  { %8 = vsyncpa [#allocation4], 0  ;;  %s747_s0 = inlined_call_operand.hbm [shape: f32[2,16,512], index: 0, kind: input, shape index: {}]   ;;  %s748_s1 = inlined_call_operand.hbm [shape: f32[512,128], index: 1, kind: input, shape index: {}]   ;;  %s749_s2 = inlined_call_operand.vmem [shape: f32[1,128], index: 2, kind: input, shape index: {}]   ;;  %s750_s3 = inlined_call_operand.hbm [shape: f32[2,128], index: 3, kind: output, shape index: {}]  }
   0x1   :  { %9 = vsyncpa [#allocation7], 0 }
   0x2   :  { %10 = vsyncpa [#allocation5], 0  ;;  %s651_s12 = smov [#allocation3]   ;;  %s579_s16 = scalar_lea.hbm %s747_s0, 2048 }
   0x3   :  { %s16_s13 = sshll.u32 %s651_s12, 4  ;;  %p580_p0 = scmp.ne.s32.totalorder %s747_s0, %s579_s16  ;;  %s17_s13 = int_to_ptr.vmem [resolvable:$true] %s16_s13 }
   0x4   :  { %p583_p1 = scmp.lt.u32.totalorder %s579_s16, %s747_s0 }
   0x6   :  { %p585_p2 = pnand %p583_p1, %p580_p0 }
   0x8   :  { %588 = shalt.err (!%p585_p2)
}
   0x9   :  { %s589_s21 = scalar_lea.vmem %s17_s13, 2048  ;;  %p594_p4 = scmp.lt.s32.totalorder %s17_s13, %s17_s13 }
   0xa   :  { %p590_p3 = scmp.ne.s32.totalorder %s17_s13, %s589_s21  ;;  %p595_p5 = scmp.lt.s32.totalorder %s589_s21, %s589_s21 }
   0xc   :  { %p596_p6 = por %p595_p5, %p594_p4 }
   0xe   :  { %p597_p7 = pnand %p596_p6, %p590_p3 }
  0x10   :  { %600 = shalt.err (!%p597_p7)
}
  0x11   :  { %s652_s22 = smov 512   ;;  %s653_s23 = smov 32  }
  0x12   :  { %22 = dma.hbm_to_vmem [thread:$0]  %s747_s0, 2048, %s17_s13, [#allocation4], %s652_s22, %s652_s22, %s653_s23  }
  0x13   :  { %s654_s26 = smov [#allocation6]   ;;  %s601_s30 = scalar_lea.hbm %s748_s1, 8192 }
  0x14   :  { %s28_s27 = sshll.u32 %s654_s26, 4  ;;  %p602_p8 = scmp.ne.s32.totalorder %s748_s1, %s601_s30  ;;  %s29_s27 = int_to_ptr.vmem [resolvable:$true] %s28_s27 }
  0x15   :  { %p605_p9 = scmp.lt.u32.totalorder %s601_s30, %s748_s1 }
  0x17   :  { %p607_p10 = pnand %p605_p9, %p602_p8 }
  0x19   :  { %610 = shalt.err (!%p607_p10)
}
  0x1a   :  { %s611_s8 = scalar_lea.vmem %s29_s27, 8192  ;;  %p616_p12 = scmp.lt.s32.totalorder %s29_s27, %s29_s27 }
  0x1b   :  { %p612_p11 = scmp.ne.s32.totalorder %s29_s27, %s611_s8  ;;  %p617_p13 = scmp.lt.s32.totalorder %s611_s8, %s611_s8 }
  0x1d   :  { %p618_p0 = por %p617_p13, %p616_p12 }
  0x1f   :  { %p619_p1 = pnand %p618_p0, %p612_p11 }
  0x21   :  { %622 = shalt.err (!%p619_p1)
}
  0x22   :  { %s655_s0 = smov 128   ;;  %s656_s9 = smov 8  }
  0x23   :  { %34 = dma.hbm_to_vmem [thread:$0]  %s748_s1, 8192, %s29_s27, [#allocation7], %s655_s0, %s655_s0, %s656_s9  }
  0x24   :  { %645 = dma.done.wait [#allocation4], 2048  }
  0x25   :  { %646 = vsyncadd [#allocation4], 4294965248 }
  0x26   :  { %647 = dma.done.wait [#allocation7], 8192  }
  0x27   :  { %648 = vsyncadd [#allocation7], 4294959104  ;;  %v202_v0 = vld [vmem:[#allocation6 + $0x80] sm:$0xff]  ;;  %v203_v1 = vld [vmem:[#allocation6 + $0x88] sm:$0xff]  ;;  %vm168_vm0 = vcmask 1041409   ;;  %vm170_vm1 = vcmask 1043459  }
  0x28   :  { %v186_v2 = vld [vmem:[#allocation6] sm:$0xff]  ;;  %v507_v3 = vpack.c.bf16 %v203_v1, %v202_v0  ;;  %v187_v4 = vld [vmem:[#allocation6 + $0x8] sm:$0xff]  ;;  %v204_v11 = vld [vmem:[#allocation6 + $0x90] sm:$0xff]  ;;  %vm172_vm2 = vcmask 1045509   ;;  %vm174_vm3 = vcmask 1047559   ;;  %s658_s13 = smov [#allocation8]  }
  0x29   :  { %v234_v5 = vld [vmem:[#allocation6 + $0x180] sm:$0xff]  ;;  %v235_v6 = vld [vmem:[#allocation6 + $0x188] sm:$0xff]  ;;  %v509_v7 = vpack.c.bf16 %v187_v4, %v186_v2  ;;  %v205_v13 = vld [vmem:[#allocation6 + $0x98] sm:$0xff]  ;;  %s426_s14 = sshll.u32 %s658_s13, 4  ;;  %s427_s14 = int_to_ptr.vmem [resolvable:$true] %s426_s14 }
  0x2a   :  { %v539_v8 = vpack.c.bf16 %v235_v6, %v234_v5  ;;  %v218_v9 = vld [vmem:[#allocation6 + $0x100] sm:$0xff]  ;;  %v219_v10 = vld [vmem:[#allocation6 + $0x108] sm:$0xff]  ;;  %508 = vmatprep.subr.bf16.mxu0 %v507_v3  ;;  %v188_v14 = vld [vmem:[#allocation6 + $0x10] sm:$0xff]  ;;  %v511_v16 = vpack.c.bf16 %v205_v13, %v204_v11  ;;  %s623_s15 = scalar_lea.vmem %s427_s14, 32  ;;  %p628_p3 = scmp.lt.s32.totalorder %s427_s14, %s427_s14 }
  0x2b   :  { %v541_v12 = vpack.c.bf16 %v219_v10, %v218_v9  ;;  %v189_v15 = vld [vmem:[#allocation6 + $0x18] sm:$0xff]  ;;  %510 = vmatpush3.bf16.msra.mxu0 %v509_v7  ;;  %v236_v18 = vld [vmem:[#allocation6 + $0x190] sm:$0xff]  ;;  %v206_v23 = vld [vmem:[#allocation6 + $0xa0] sm:$0xff]  ;;  %p624_p2 = scmp.ne.s32.totalorder %s427_s14, %s623_s15  ;;  %p629_p4 = scmp.lt.s32.totalorder %s623_s15, %s623_s15 }
  0x2c   :  { %540 = vmatprep.subr.bf16.mxu1 %v539_v8  ;;  %v513_v17 = vpack.c.bf16 %v189_v15, %v188_v14  ;;  %v237_v19 = vld [vmem:[#allocation6 + $0x198] sm:$0xff]  ;;  %v220_v20 = vld [vmem:[#allocation6 + $0x110] sm:$0xff]  ;;  %v207_v24 = vld [vmem:[#allocation6 + $0xa8] sm:$0xff]  ;;  %512 = vmatprep.subr.bf16.mxu0 %v511_v16  ;;  %v657_v14 = vmov 1983009808   ;;  %v134_v16 = vlaneseq }
  0x2d   :  { %542 = vmatpush3.bf16.msra.mxu1 %v541_v12  ;;  %v543_v21 = vpack.c.bf16 %v237_v19, %v236_v18  ;;  %v221_v22 = vld [vmem:[#allocation6 + $0x118] sm:$0xff]  ;;  %v515_v26 = vpack.c.bf16 %v207_v24, %v206_v23  ;;  %v190_v27 = vld [vmem:[#allocation6 + $0x20] sm:$0xff]  ;;  %v191_v28 = vld [vmem:[#allocation6 + $0x28] sm:$0xff]  ;;  %v711_v15 = vunpack.c.l.s4 %v657_v14  ;;  %p630_p5 = por %p629_p4, %p628_p3 }
  0x2e   :  { %v545_v25 = vpack.c.bf16 %v221_v22, %v220_v20  ;;  %v238_v29 = vld [vmem:[#allocation6 + $0x1a0] sm:$0xff]  ;;  %v239_v30 = vld [vmem:[#allocation6 + $0x1a8] sm:$0xff]  ;;  %v517_v33 = vpack.c.bf16 %v191_v28, %v190_v27  ;;  %v208_v35 = vld [vmem:[#allocation6 + $0xb0] sm:$0xff] }
  0x2f   :  { %544 = vmatprep.subr.bf16.mxu1 %v543_v21  ;;  %v222_v31 = vld [vmem:[#allocation6 + $0x120] sm:$0xff]  ;;  %v223_v32 = vld [vmem:[#allocation6 + $0x128] sm:$0xff]  ;;  %514 = vmatpush3.bf16.msra.mxu0 %v513_v17  ;;  %v547_v34 = vpack.c.bf16 %v239_v30, %v238_v29  ;;  %v209_v36 = vld [vmem:[#allocation6 + $0xb8] sm:$0xff]  ;;  %p631_p6 = pnand %p630_p5, %p624_p2 }
  0x30   :  { %v192_v37 = vld [vmem:[#allocation6 + $0x30] sm:$0xff]  ;;  %516 = vmatprep.subr.bf16.mxu0 %v515_v26  ;;  %v549_v38 = vpack.c.bf16 %v223_v32, %v222_v31  ;;  %v519_v39 = vpack.c.bf16 %v209_v36, %v208_v35  ;;  %v193_v40 = vld [vmem:[#allocation6 + $0x38] sm:$0xff]  ;;  %v210_v46 = vld [vmem:[#allocation6 + $0xc0] sm:$0xff]  ;;  %v133_v35 = vunpack.c.0.s8 %v711_v15  ;;  %v722_v36 = vshrl.u32 %v134_v16, 7 }
  0x31   :  { %546 = vmatpush3.bf16.msra.mxu1 %v545_v25  ;;  %v240_v41 = vld [vmem:[#allocation6 + $0x1b0] sm:$0xff]  ;;  %v241_v42 = vld [vmem:[#allocation6 + $0x1b8] sm:$0xff]  ;;  %v211_v47 = vld [vmem:[#allocation6 + $0xc8] sm:$0xff]  ;;  %v521_v48 = vpack.c.bf16 %v193_v40, %v192_v37 }
  0x32   :  { %548 = vmatprep.subr.bf16.mxu1 %v547_v34  ;;  %v551_v43 = vpack.c.bf16 %v241_v42, %v240_v41  ;;  %v224_v44 = vld [vmem:[#allocation6 + $0x130] sm:$0xff]  ;;  %v225_v45 = vld [vmem:[#allocation6 + $0x138] sm:$0xff]  ;;  %v242_v49 = vld [vmem:[#allocation6 + $0x1c0] sm:$0xff]  ;;  %v523_v52 = vpack.c.bf16 %v211_v47, %v210_v46 }
  0x33   :  { %518 = vmatpush3.bf16.msra.mxu0 %v517_v33  ;;  %v243_v50 = vld [vmem:[#allocation6 + $0x1c8] sm:$0xff]  ;;  %v553_v51 = vpack.c.bf16 %v225_v45, %v224_v44  ;;  %v194_v53 = vld [vmem:[#allocation6 + $0x40] sm:$0xff]  ;;  %v212_v58 = vld [vmem:[#allocation6 + $0xd0] sm:$0xff] }
  0x34   :  { %520 = vmatprep.subr.bf16.mxu0 %v519_v39  ;;  %v195_v54 = vld [vmem:[#allocation6 + $0x48] sm:$0xff]  ;;  %v226_v55 = vld [vmem:[#allocation6 + $0x140] sm:$0xff]  ;;  %v555_v56 = vpack.c.bf16 %v243_v50, %v242_v49  ;;  %v213_v59 = vld [vmem:[#allocation6 + $0xd8] sm:$0xff] }
  0x35   :  { %550 = vmatpush3.bf16.msra.mxu1 %v549_v38  ;;  %v227_v57 = vld [vmem:[#allocation6 + $0x148] sm:$0xff]  ;;  %v196_v60 = vld [vmem:[#allocation6 + $0x50] sm:$0xff]  ;;  %v197_v61 = vld [vmem:[#allocation6 + $0x58] sm:$0xff]  ;;  %v525_v0 = vpack.c.bf16 %v195_v54, %v194_v53  ;;  %v527_v6 = vpack.c.bf16 %v213_v59, %v212_v58 }
  0x36   :  { %552 = vmatprep.subr.bf16.mxu1 %v551_v43  ;;  %v244_v62 = vld [vmem:[#allocation6 + $0x1d0] sm:$0xff]  ;;  %v245_v63 = vld [vmem:[#allocation6 + $0x1d8] sm:$0xff]  ;;  %v214_v3 = vld [vmem:[#allocation6 + $0xe0] sm:$0xff]  ;;  %v557_v5 = vpack.c.bf16 %v227_v57, %v226_v55  ;;  %v529_v21 = vpack.c.bf16 %v197_v61, %v196_v60 }
  0x37   :  { %522 = vmatpush3.bf16.msra.mxu0 %v521_v48  ;;  %v228_v1 = vld [vmem:[#allocation6 + $0x150] sm:$0xff]  ;;  %v229_v2 = vld [vmem:[#allocation6 + $0x158] sm:$0xff]  ;;  %v215_v4 = vld [vmem:[#allocation6 + $0xe8] sm:$0xff]  ;;  %v559_v10 = vpack.c.bf16 %v245_v63, %v244_v62 }
  0x38   :  { %524 = vmatprep.subr.bf16.mxu0 %v523_v52  ;;  %v703_v7 = vld [vmem:[#allocation6 + $0x60] sm:$0xff]  ;;  %v705_v8 = vld [vmem:[#allocation6 + $0x68] sm:$0xff]  ;;  %v713_v17 = vld [vmem:[#allocation6 + $0xf0] sm:$0xff]  ;;  %v561_v25 = vpack.c.bf16 %v229_v2, %v228_v1  ;;  %v531_v26 = vpack.c.bf16 %v215_v4, %v214_v3 }
  0x39   :  { %554 = vmatpush3.bf16.msra.mxu1 %v553_v51  ;;  %v246_v9 = vld [vmem:[#allocation6 + $0x1e0] sm:$0xff]  ;;  %v247_v11 = vld [vmem:[#allocation6 + $0x1e8] sm:$0xff]  ;;  %v217_v18 = vld [vmem:[#allocation6 + $0xf8] sm:$0xff]  ;;  %v533_v30 = vpack.c.bf16 %v705_v8, %v703_v7 }
  0x3a   :  { %556 = vmatprep.subr.bf16.mxu1 %v555_v56  ;;  %v707_v12 = vld [vmem:[#allocation6 + $0x160] sm:$0xff]  ;;  %v709_v13 = vld [vmem:[#allocation6 + $0x168] sm:$0xff]  ;;  %v715_v19 = vld [vmem:[#allocation6 + $0x70] sm:$0xff]  ;;  %v563_v31 = vpack.c.bf16 %v247_v11, %v246_v9  ;;  %v535_v44 = vpack.c.bf16 %v217_v18, %v713_v17 }
  0x3b   :  { %v717_v20 = vld [vmem:[#allocation6 + $0x78] sm:$0xff]  ;;  %526 = vmatpush3.bf16.msra.mxu0 %v525_v0  ;;  %v248_v22 = vld [vmem:[#allocation6 + $0x1f0] sm:$0xff]  ;;  %v48_v24 = vld [vmem:[#allocation3] sm:$0xff]  ;;  %v565_v37 = vpack.c.bf16 %v709_v13, %v707_v12 }
  0x3c   :  { %v249_v23 = vld [vmem:[#allocation6 + $0x1f8] sm:$0xff]  ;;  %528 = vmatprep.subr.bf16.mxu0 %v527_v6  ;;  %v49_v27 = vld [vmem:[#allocation3 + $0x8] sm:$0xff]  ;;  %v50_v28 = vld [vmem:[#allocation3 + $0x10] sm:$0xff]  ;;  %v537_v45 = vpack.c.bf16 %v717_v20, %v715_v19 }
  0x3d   :  { %558 = vmatpush3.bf16.msra.mxu1 %v557_v5  ;;  %v51_v29 = vld [vmem:[#allocation3 + $0x18] sm:$0xff]  ;;  %v52_v32 = vld [vmem:[#allocation3 + $0x20] sm:$0xff]  ;;  %v53_v33 = vld [vmem:[#allocation3 + $0x28] sm:$0xff]  ;;  %v567_v46 = vpack.c.bf16 %v249_v23, %v248_v22 }
  0x3e   :  { %560 = vmatprep.subr.bf16.mxu1 %v559_v10  ;;  %v54_v34 = vld [vmem:[#allocation3 + $0x30] sm:$0xff]  ;;  %v55_v38 = vld [vmem:[#allocation3 + $0x38] sm:$0xff]  ;;  %v56_v39 = vld [vmem:[#allocation3 + $0x40] sm:$0xff]  ;;  %v64_v41 = vmax.f32 %v48_v24, %v52_v32  ;;  %v71_v42 = vmax.f32 %v49_v27, %v53_v33 }
  0x3f   :  { %v57_v40 = vld [vmem:[#allocation3 + $0x48] sm:$0xff]  ;;  %v78_v43 = vmax.f32 %v50_v28, %v54_v34  ;;  %530 = vmatpush3.bf16.msra.mxu0 %v529_v21  ;;  %v58_v47 = vld [vmem:[#allocation3 + $0x50] sm:$0xff]  ;;  %v59_v48 = vld [vmem:[#allocation3 + $0x58] sm:$0xff]  ;;  %v85_v50 = vmax.f32 %v51_v29, %v55_v38 }
  0x40   :  { %v60_v49 = vld [vmem:[#allocation3 + $0x60] sm:$0xff]  ;;  %532 = vmatprep.subr.bf16.mxu0 %v531_v26  ;;  %v61_v51 = vld [vmem:[#allocation3 + $0x68] sm:$0xff]  ;;  %v62_v52 = vld [vmem:[#allocation3 + $0x70] sm:$0xff]  ;;  %v65_v54 = vrot.slane %v64_v41, 4  ;;  %v72_v55 = vrot.slane %v71_v42, 4 }
  0x41   :  { %562 = vmatpush3.bf16.msra.mxu1 %v561_v25  ;;  %v63_v53 = vld [vmem:[#allocation3 + $0x78] sm:$0xff]  ;;  %v79_v56 = vrot.slane %v78_v43, 4  ;;  %v92_v57 = vmax.f32 %v56_v39, %v60_v49  ;;  %v86_v58 = vrot.slane %v85_v50, 4  ;;  %v99_v59 = vmax.f32 %v57_v40, %v61_v51 }
  0x42   :  { %564 = vmatprep.subr.bf16.mxu1 %v563_v31  ;;  %v106_v60 = vmax.f32 %v58_v47, %v62_v52  ;;  %v113_v61 = vmax.f32 %v59_v48, %v63_v53  ;;  %v66_v62 = vmax.f32 %v64_v41, %v65_v54  ;;  %v73_v63 = vmax.f32 %v71_v42, %v72_v55  ;;  %v232_v31 = vld [vmem:[#allocation6 + $0x170] sm:$0xff]  ;;  %v233_v32 = vld [vmem:[#allocation6 + $0x178] sm:$0xff] }
  0x43   :  { %v80_v0 = vmax.f32 %v78_v43, %v79_v56  ;;  %v93_v1 = vrot.slane %v92_v57, 4  ;;  %534 = vmatpush3.bf16.msra.mxu0 %v533_v30  ;;  %v87_v2 = vmax.f32 %v85_v50, %v86_v58  ;;  %v100_v3 = vrot.slane %v99_v59, 4 }
  0x44   :  { %v107_v4 = vrot.slane %v106_v60, 4  ;;  %v114_v5 = vrot.slane %v113_v61, 4  ;;  %536 = vmatprep.subr.bf16.mxu0 %v535_v44  ;;  %v67_v6 = vrot.slane %v66_v62, 2  ;;  %v74_v7 = vrot.slane %v73_v63, 2 }
  0x45   :  { %566 = vmatpush3.bf16.msra.mxu1 %v565_v37  ;;  %v81_v8 = vrot.slane %v80_v0, 2  ;;  %v94_v9 = vmax.f32 %v92_v57, %v93_v1  ;;  %v88_v10 = vrot.slane %v87_v2, 2  ;;  %v101_v11 = vmax.f32 %v99_v59, %v100_v3 }
  0x46   :  { %568 = vmatprep.subr.bf16.mxu1 %v567_v46  ;;  %v108_v12 = vmax.f32 %v106_v60, %v107_v4  ;;  %v115_v13 = vmax.f32 %v113_v61, %v114_v5  ;;  %v68_v14 = vmax.f32 %v66_v62, %v67_v6  ;;  %v75_v16 = vmax.f32 %v73_v63, %v74_v7  ;;  %v436_v5 = vld [vmem:[%s749_s2] ss:$0 sm:$0xff] }
  0x47   :  { %v82_v17 = vmax.f32 %v80_v0, %v81_v8  ;;  %v95_v18 = vrot.slane %v94_v9, 2  ;;  %538 = vmatpush3.bf16.msra.mxu0 %v537_v45  ;;  %v89_v19 = vmax.f32 %v87_v2, %v88_v10  ;;  %v102_v20 = vrot.slane %v101_v11, 2 }
  0x48   :  { %v109_v21 = vrot.slane %v108_v12, 2  ;;  %v116_v22 = vrot.slane %v115_v13, 2  ;;  %v69_v23 = vrot.slane %v68_v14, 1  ;;  %v76_v24 = vrot.slane %v75_v16, 1 }
  0x49   :  { %v83_v25 = vrot.slane %v82_v17, 1  ;;  %v96_v26 = vmax.f32 %v94_v9, %v95_v18  ;;  %v90_v27 = vrot.slane %v89_v19, 1  ;;  %v103_v28 = vmax.f32 %v101_v11, %v102_v20 }
  0x4a   :  { %v110_v29 = vmax.f32 %v108_v12, %v109_v21  ;;  %v117_v30 = vmax.f32 %v115_v13, %v116_v22  ;;  %v70_v33 = vmax.f32 %v68_v14, %v69_v23  ;;  %v77_v34 = vmax.f32 %v75_v16, %v76_v24 }
  0x4b   :  { %v84_v37 = vmax.f32 %v82_v17, %v83_v25  ;;  %v97_v38 = vrot.slane %v96_v26, 1  ;;  %v91_v39 = vmax.f32 %v89_v19, %v90_v27  ;;  %v104_v40 = vrot.slane %v103_v28, 1 }
  0x4c   :  { %v111_v41 = vrot.slane %v110_v29, 1  ;;  %v118_v42 = vrot.slane %v117_v30, 1  ;;  %v129_v44 = vcombine.low %v70_v33, %v77_v34  ;;  %v136_v45 = vsub.s32 %v133_v35, %v722_v36 }
  0x4d   :  { %v98_v43 = vmax.f32 %v96_v26, %v97_v38  ;;  %v569_v46 = vpack.c.bf16 %v233_v32, %v232_v31  ;;  %v105_v47 = vmax.f32 %v103_v28, %v104_v40  ;;  %v130_v50 = vcombine.low %v84_v37, %v91_v39 }
  0x4e   :  { %v112_v48 = vmax.f32 %v110_v29, %v111_v41  ;;  %v119_v49 = vmax.f32 %v117_v30, %v118_v42  ;;  %v137_v51 = vrot.slane %v129_v44, %v136_v45 }
  0x4f   :  { %570 = vmatpush3.bf16.msra.mxu1 %v569_v46  ;;  %v144_v52 = vrot.slane %v130_v50, %v136_v45  ;;  %v146_v53 = vcombine.low %v98_v43, %v105_v47 }
  0x50   :  { %v147_v54 = vcombine.low %v112_v48, %v119_v49 }
  0x51   :  { %v154_v55 = vrot.slane %v146_v53, %v136_v45  ;;  %v145_v57 = vcombine.low %v137_v51, %v144_v52 }
  0x52   :  { %v161_v56 = vrot.slane %v147_v54, %v136_v45 }
  0x54   :  { %v162_v58 = vcombine.low %v154_v55, %v161_v56 }
  0x56   :  { %v167_v59 = vrot.slane %v162_v58, 7 }
  0x58   :  { %v169_v15 = vsel %vm168_vm0, %v167_v59, %v145_v57 }
  0x59   :  { %v171_v35 = vsel %vm170_vm1, %v167_v59, %v169_v15 }
  0x5a   :  { %v173_v36 = vsel %vm172_vm2, %v167_v59, %v171_v35 }
  0x5b   :  { %v175_v60 = vsel %vm174_vm3, %v167_v59, %v173_v36 }
  0x5c   :  { %vm183_vm4 = vcmp.ge.f32.partialorder %v175_v60, 0.0  ;;  %v184_v61 = vmul.f32 0.01, %v175_v60 }
  0x5e   :  { %v185_v62 = vsel %vm183_vm4, %v175_v60, %v184_v61 }
  0x5f   :  { %v265_v63 = vrot.slane %v185_v62, %v136_v45  ;;  %v258_v0 = vcombine.high %v185_v62, %v185_v62 }
  0x61   :  { %v273_v1 = vcombine.high %v265_v63, %v265_v63  ;;  %v272_v2 = vrot.slane %v258_v0, %v136_v45 }
  0x63   :  { %343 = vmatprep.mubr.f32.mxu0 %v273_v1  ;;  %v274_v3 = vcombine.high %v272_v2, %v272_v2 }
  0x64   :  { %344 = vmatmul.mubr.f32.vlgmr.msra.gmra.mrb[0].mxu0 %v265_v63 }
  0x65   :  { %413 = vmatprep.mubr.f32.mxu1 %v274_v3 }
  0x66   :  { %414 = vmatmul.mubr.f32.vlgmr.msra.gmra.mrb[0].mxu1 %v272_v2 }
 0x137   :  { %v469_v4 = vpop.f32.mrb[0].mxu0 }
 0x138   :  { %v470_v6 = vpop.f32.mrb[1].mxu0 }
 0x139   :  { %v471_v7 = vadd.f32 %v470_v6, %v469_v4  ;;  %v504_v8 = vpop.f32.mrb[0].mxu1 }
 0x13a   :  { %v505_v9 = vpop.f32.mrb[1].mxu1 }
 0x13b   :  { %v346_v10 = vadd.f32 %v471_v7, %v436_v5  ;;  %v506_v11 = vadd.f32 %v505_v9, %v504_v8 }
 0x13d   :  { %v416_v12 = vadd.f32 %v506_v11, %v346_v10 }
 0x13f   :  { %419 = vst [vmem:[#allocation8] sm:$0x3] %v416_v12 }
 0x140   :  { %634 = shalt.err (!%p631_p6)
}
 0x141   :  { %s635_s17 = scalar_lea.hbm %s750_s3, 32 }
 0x142   :  { %p636_p7 = scmp.ne.s32.totalorder %s750_s3, %s635_s17  ;;  %p639_p8 = scmp.lt.u32.totalorder %s635_s17, %s750_s3 }
 0x144   :  { %p641_p9 = pnand %p639_p8, %p636_p7 }
 0x146   :  { %644 = shalt.err (!%p641_p9)
}
 0x147   :  { %429 = dma.vmem_to_hbm [thread:$0]  %s427_s14, 32, %s750_s3, [#allocation5]  }
 0x148   :  { %649 = dma.done.wait [#allocation5], 32  }
 0x149   :  { %650 = vsyncadd [#allocation5], 4294967264 }
 0x14a   :  { %433 = vsyncpa [#allocation4], 1 }
 0x14b   :  { %434 = vsyncpa [#allocation7], 1 }
 0x14c   :  { %435 = vsyncpa [#allocation5], 1 }

</bundles_post_ra>
